<compile_context>
chip_gen: v5e
topology: v5e:2x2
jax: 0.10.0
libtpu: 0.0.40
codegen_flags: <defaults>
</compile_context>

<pallas_src>
import functools
import math

import jax
import jax.numpy as jnp
from jax import lax
from jax.experimental import pallas as pl
from jax.experimental.pallas import tpu as pltpu


def _round_up(x, m):
    return (x + m - 1) // m * m


def _cosface_kernel(x_ref, wn_ref, gt_ref, loss_ref,
                    xn_ref, m_ref, l_ref, t_ref,
                    *, scale, margin, num_classes, class_tile, mask_classes):
    k = pl.program_id(1)
    nk = pl.num_programs(1)

    eps_sq = 1e-24  # (1e-12)^2 -> rsqrt(max(sumsq, eps^2)) == 1/max(||v||, eps)

    @pl.when(k == 0)
    def _init():
        # Normalize x once per B-tile (f32 math), store in the MXU dtype.
        x = x_ref[...].astype(jnp.float32)
        sumsq = jnp.sum(x * x, axis=1, keepdims=True)
        xn = x * lax.rsqrt(jnp.maximum(sumsq, eps_sq))
        xn_ref[...] = xn.astype(xn_ref.dtype)
        m_ref[...] = jnp.full(m_ref.shape, -jnp.inf, dtype=jnp.float32)
        l_ref[...] = jnp.zeros(l_ref.shape, dtype=jnp.float32)
        t_ref[...] = jnp.zeros(t_ref.shape, dtype=jnp.float32)

    # Plain [tb, E] x [E, tc] contraction; pre-normalized weights streamed as-is.
    # f32 accumulation on the MXU regardless of operand dtype.
    cos = jnp.dot(xn_ref[...], wn_ref[...],
                  preferred_element_type=jnp.float32)          # [tb, tc]

    gt_col = gt_ref[...]                                        # [tb, 1] int32
    class_ids = k * class_tile + lax.broadcasted_iota(jnp.int32, cos.shape, 1)
    onehot = class_ids == gt_col                                # [tb, tc] bool

    # logits = scale * (cos - margin * onehot)
    logits = scale * cos - jnp.where(onehot, scale * margin, 0.0)
    if mask_classes:
        # Only emitted when C was padded up to a 128 multiple.
        logits = jnp.where(class_ids < num_classes, logits, -jnp.inf)

    # Online logsumexp over the class axis.
    # TODO(synk): on v6e/v7x, if the EUP exp becomes binding after the memory
    # fixes, evaluate a bf16 exp with f32 accumulation (validate vs scale=64).
    m_prev = m_ref[...]
    m_new = jnp.maximum(m_prev, jnp.max(logits, axis=1, keepdims=True))
    alpha = jnp.exp(m_prev - m_new)
    l_ref[...] = alpha * l_ref[...] + jnp.sum(jnp.exp(logits - m_new),
                                              axis=1, keepdims=True)
    m_ref[...] = m_new
    # Each row's label lands in exactly one class tile; accumulate its (already
    # margin-adjusted, scaled) logit directly.
    t_ref[...] += jnp.sum(jnp.where(onehot, logits, 0.0), axis=1, keepdims=True)

    @pl.when(k == nk - 1)
    def _finalize():
        loss_ref[...] = m_ref[...] + jnp.log(l_ref[...]) - t_ref[...]


def cosface_header(x, wt, gt, *, scale=64.0, margin=0.35,
                   batch_tile=256, class_tile=2048, use_bf16_matmul=True,
                   vmem_budget_bytes=40 * 1024 * 1024):
    """x: [B, E] float, wt: [C, E] float, gt: [B] int -> scalar f32 mean CE loss.

    batch_tile: raise as high as B / VMEM allow — weight HBM traffic scales with
      B / batch_tile.  Multiples of 256 fill the v6e/v7x MXU; on v7x keep at
      least 2 batch tiles if you want both TensorCores busy.
    class_tile: large (2048+) to amortize per-step overhead on big heads; it is
      auto-shrunk so double-buffered tiles fit `vmem_budget_bytes` (v7x-safe).
    use_bf16_matmul: bf16 MXU operands (good on v5e/v6e/v7x); normalization and
      softmax math stay f32.
    """
    B, E = x.shape
    C, E2 = wt.shape
    assert E == E2

    mm_dtype = jnp.bfloat16 if use_bf16_matmul else jnp.float32

    # Pre-normalize the class weights ONCE (f32 math), lay out as [E, C] so the
    # kernel contraction is transpose-free, then cast to the streaming dtype.
    wt_f32 = wt.astype(jnp.float32)
    w_sumsq = jnp.sum(wt_f32 * wt_f32, axis=1, keepdims=True)
    wn = wt_f32 * lax.rsqrt(jnp.maximum(w_sumsq, 1e-24))
    wn_t = wn.T.astype(mm_dtype)                                  # [E, C]

    # Tile selection.
    tb = _round_up(min(batch_tile, _round_up(B, 8)), 8)
    tc = _round_up(min(class_tile, _round_up(C, 128)), 128)

    x_elt = jnp.dtype(x.dtype).itemsize
    w_elt = jnp.dtype(mm_dtype).itemsize

    def _footprint(tc_):
        return (2 * E * tc_ * w_elt       # double-buffered [E, tc] weight tile
                + 2 * tb * E * x_elt      # double-buffered [tb, E] x tile
                + tb * E * w_elt          # resident normalized-x scratch
                + 8 * tb * 4)             # per-row scratches + loss tile (approx)

    while tc > 128 and _footprint(tc) > vmem_budget_bytes:
        tc = max(128, _round_up(tc // 2, 128))

    b_pad = _round_up(B, tb)
    c_pad = _round_up(C, tc)

    if b_pad != B:
        x = jnp.pad(x, ((0, b_pad - B), (0, 0)))
        gt = jnp.pad(gt, (0, b_pad - B))
    if c_pad != C:
        wn_t = jnp.pad(wn_t, ((0, 0), (0, c_pad - C)))

    gt2d = gt.reshape(b_pad, 1).astype(jnp.int32)

    grid = (b_pad // tb, c_pad // tc)

    kernel = functools.partial(
        _cosface_kernel,
        scale=float(scale), margin=float(margin), num_classes=C,
        class_tile=tc, mask_classes=(c_pad != C))

    vmem_limit = int(min(64 * 1024 * 1024,
                         max(32 * 1024 * 1024, 1.5 * _footprint(tc))))

    # TODO(synk): if the weight DMA is still exposed for small-B configs after
    # the larger tiles, raise the weight spec's buffering with
    # pipeline_mode=pl.Buffered(3).
    per_sample = pl.pallas_call(
        kernel,
        out_shape=jax.ShapeDtypeStruct((b_pad, 1), jnp.float32),
        grid_spec=pltpu.PrefetchScalarGridSpec(
            num_scalar_prefetch=0,
            grid=grid,
            in_specs=[
                pl.BlockSpec((tb, E), lambda i, k: (i, 0)),   # x
                pl.BlockSpec((E, tc), lambda i, k: (0, k)),   # normalized W^T (streamed)
                pl.BlockSpec((tb, 1), lambda i, k: (i, 0)),   # labels
            ],
            out_specs=pl.BlockSpec((tb, 1), lambda i, k: (i, 0)),
            scratch_shapes=[
                pltpu.VMEM((tb, E), mm_dtype),       # normalized x (per B-tile)
                pltpu.VMEM((tb, 1), jnp.float32),    # running max m
                pltpu.VMEM((tb, 1), jnp.float32),    # running sum l
                pltpu.VMEM((tb, 1), jnp.float32),    # target logit
            ],
        ),
        compiler_params=pltpu.CompilerParams(
            dimension_semantics=("parallel", "arbitrary"),
            vmem_limit_bytes=vmem_limit),
    )(x, wn_t, gt2d)

    # Mean over the true (unpadded) batch.
    return jnp.sum(per_sample[:B, 0]) / B


def _reference(x, wt, gt, scale=64.0, margin=0.35):
    eps = 1e-12
    xn = x / jnp.maximum(jnp.linalg.norm(x, axis=1, keepdims=True), eps)
    wn = wt / jnp.maximum(jnp.linalg.norm(wt, axis=1, keepdims=True), eps)
    cos = jnp.matmul(xn, wn.T, precision=jax.lax.Precision.HIGHEST)
    onehot = jax.nn.one_hot(gt, wt.shape[0])
    logits = scale * (cos - onehot * margin)
    logp = jax.nn.log_softmax(logits, axis=-1)
    return -jnp.mean(jnp.sum(onehot * logp, axis=-1))


if __name__ == "__main__":
    key = jax.random.PRNGKey(0)

    def make_inputs(key, batch, num_classes, emb_size):
        kx, kw, kg = jax.random.split(key, 3)
        std = math.sqrt(2.0 / emb_size)  # kaiming_normal_ fan_in = emb_size
        wt = jax.random.normal(kw, (num_classes, emb_size), jnp.float32) * std
        x = jax.random.normal(kx, (batch, emb_size), jnp.float32)
        gt = jax.random.randint(kg, (batch,), 0, num_classes, dtype=jnp.int32)
        return x, wt, gt

    k1, k2 = jax.random.split(key)

    # Config 1: single tile on both axes (module's nominal small shape).
    x1, wt1, gt1 = make_inputs(k1, batch=8, num_classes=16, emb_size=32)
    ref1 = _reference(x1, wt1, gt1)

    loss1_f32 = cosface_header(x1, wt1, gt1, scale=64.0, margin=0.35,
                               use_bf16_matmul=False)
    jax.block_until_ready(loss1_f32)
    assert jnp.allclose(loss1_f32, ref1, rtol=1e-3, atol=1e-3), (loss1_f32, ref1)

    loss1_bf16 = cosface_header(x1, wt1, gt1, scale=64.0, margin=0.35)
    jax.block_until_ready(loss1_bf16)
    assert jnp.allclose(loss1_bf16, ref1, rtol=2e-2, atol=2e-1), (loss1_bf16, ref1)

    # Config 2: exercises batch/class padding, multiple tiles and the online
    # logsumexp across class tiles (grid = (3, 3)).
    x2, wt2, gt2 = make_inputs(k2, batch=20, num_classes=300, emb_size=32)
    ref2 = _reference(x2, wt2, gt2)

    loss2_f32 = cosface_header(x2, wt2, gt2, scale=64.0, margin=0.35,
                               batch_tile=8, class_tile=128,
                               use_bf16_matmul=False)
    jax.block_until_ready(loss2_f32)
    assert jnp.allclose(loss2_f32, ref2, rtol=1e-3, atol=1e-3), (loss2_f32, ref2)

    loss2_bf16 = cosface_header(x2, wt2, gt2, scale=64.0, margin=0.35,
                                batch_tile=8, class_tile=128)
    jax.block_until_ready(loss2_bf16)
    assert jnp.allclose(loss2_bf16, ref2, rtol=2e-2, atol=2e-1), (loss2_bf16, ref2)

    print("KERNEL_OK")
</pallas_src>

<mosaic_0001>
module attributes {stable_mosaic.version = 11 : i64} {
  func.func @_cosface_kernel(%arg0: i32, %arg1: i32, %arg2: memref<8x32xf32, #tpu.memory_space<vmem>>, %arg3: memref<32x128xf32, #tpu.memory_space<vmem>>, %arg4: memref<8x1xi32, #tpu.memory_space<vmem>>, %arg5: memref<8x1xf32, #tpu.memory_space<vmem>>, %arg6: memref<8x32xf32, #tpu.memory_space<vmem>>, %arg7: memref<8x1xf32, #tpu.memory_space<vmem>>, %arg8: memref<8x1xf32, #tpu.memory_space<vmem>>, %arg9: memref<8x1xf32, #tpu.memory_space<vmem>>) attributes {dimension_semantics = [#tpu.dimension_semantics<parallel>, #tpu.dimension_semantics<arbitrary>], iteration_bounds = array<i64: 1, 1>, scalar_prefetch = 0 : i64, scratch_operands = 4 : i64, tpu.core_type = #tpu.core_type<tc>, window_params = [{transform_indices = @transform_0, window_bounds = array<i64: 8, 32>}, {transform_indices = @transform_1, window_bounds = array<i64: 32, 128>}, {transform_indices = @transform_2, window_bounds = array<i64: 8, 1>}, {transform_indices = @transform_3, window_bounds = array<i64: 8, 1>}]} {
    %c0_i32 = arith.constant 0 : i32
    %0 = arith.cmpi eq, %arg1, %c0_i32 : i32
    %1 = arith.extui %0 : i1 to i32
    %c0_i32_0 = arith.constant 0 : i32
    %2 = arith.cmpi ne, %1, %c0_i32_0 : i32
    scf.if %2 {
      %c0_28 = arith.constant 0 : index
      %c0_29 = arith.constant 0 : index
      %49 = vector.load %arg2[%c0_28, %c0_29] : memref<8x32xf32, #tpu.memory_space<vmem>>, vector<8x32xf32>
      %50 = arith.mulf %49, %49 : vector<8x32xf32>
      %cst_30 = arith.constant dense<0.000000e+00> : vector<8xf32>
      %51 = vector.multi_reduction <add>, %50, %cst_30 [1] : vector<8x32xf32> to vector<8xf32>
      %52 = vector.shape_cast %51 : vector<8xf32> to vector<8x1xf32>
      %cst_31 = arith.constant 1.000000e-24 : f32
      %53 = vector.broadcast %cst_31 : f32 to vector<8x1xf32>
      %54 = arith.maximumf %52, %53 : vector<8x1xf32>
      %55 = math.rsqrt %54 : vector<8x1xf32>
      %56 = vector.broadcast %55 : vector<8x1xf32> to vector<8x32xf32>
      %57 = arith.mulf %49, %56 : vector<8x32xf32>
      %c0_32 = arith.constant 0 : index
      %c0_33 = arith.constant 0 : index
      %58 = vector.load %arg6[%c0_32, %c0_33] : memref<8x32xf32, #tpu.memory_space<vmem>>, vector<8x32xf32>
      tpu.vector_store %arg6[%c0_32, %c0_33], %57 {strides = array<i32>} : memref<8x32xf32, #tpu.memory_space<vmem>>, vector<8x32xf32>,
      %cst_34 = arith.constant 0xFF800000 : f32
      %59 = vector.broadcast %cst_34 : f32 to vector<8x1xf32>
      %c0_35 = arith.constant 0 : index
      %c0_36 = arith.constant 0 : index
      %60 = vector.load %arg7[%c0_35, %c0_36] : memref<8x1xf32, #tpu.memory_space<vmem>>, vector<8x1xf32>
      tpu.vector_store %arg7[%c0_35, %c0_36], %59 {strides = array<i32>} : memref<8x1xf32, #tpu.memory_space<vmem>>, vector<8x1xf32>,
      %cst_37 = arith.constant 0.000000e+00 : f32
      %61 = vector.broadcast %cst_37 : f32 to vector<8x1xf32>
      %c0_38 = arith.constant 0 : index
      %c0_39 = arith.constant 0 : index
      %62 = vector.load %arg8[%c0_38, %c0_39] : memref<8x1xf32, #tpu.memory_space<vmem>>, vector<8x1xf32>
      tpu.vector_store %arg8[%c0_38, %c0_39], %61 {strides = array<i32>} : memref<8x1xf32, #tpu.memory_space<vmem>>, vector<8x1xf32>,
      %cst_40 = arith.constant 0.000000e+00 : f32
      %63 = vector.broadcast %cst_40 : f32 to vector<8x1xf32>
      %c0_41 = arith.constant 0 : index
      %c0_42 = arith.constant 0 : index
      %64 = vector.load %arg9[%c0_41, %c0_42] : memref<8x1xf32, #tpu.memory_space<vmem>>, vector<8x1xf32>
      tpu.vector_store %arg9[%c0_41, %c0_42], %63 {strides = array<i32>} : memref<8x1xf32, #tpu.memory_space<vmem>>, vector<8x1xf32>,
    } else {
    }
    %c0 = arith.constant 0 : index
    %c0_1 = arith.constant 0 : index
    %3 = vector.load %arg6[%c0, %c0_1] : memref<8x32xf32, #tpu.memory_space<vmem>>, vector<8x32xf32>
    %c0_2 = arith.constant 0 : index
    %c0_3 = arith.constant 0 : index
    %4 = vector.load %arg3[%c0_2, %c0_3] : memref<32x128xf32, #tpu.memory_space<vmem>>, vector<32x128xf32>
    %cst = arith.constant dense<0.000000e+00> : vector<8x128xf32>
    %5 = tpu.matmul %3, %4, %cst {dimension_numbers = #tpu.dot_dimension_numbers<[1], [0], [0], [1], [0, 0, 1, 1], [], []>} : vector<8x32xf32>, vector<32x128xf32>, vector<8x128xf32> -> vector<8x128xf32>
    %c0_4 = arith.constant 0 : index
    %c0_5 = arith.constant 0 : index
    %6 = vector.load %arg4[%c0_4, %c0_5] : memref<8x1xi32, #tpu.memory_space<vmem>>, vector<8x1xi32>
    %c128_i32 = arith.constant 128 : i32
    %7 = arith.muli %arg1, %c128_i32 : i32
    %8 = tpu.iota {dimensions = array<i32: 1>} : vector<8x128xi32>
    %9 = vector.broadcast %7 : i32 to vector<8x128xi32>
    %10 = arith.addi %9, %8 : vector<8x128xi32>
    %11 = vector.broadcast %6 : vector<8x1xi32> to vector<8x128xi32>
    %12 = arith.cmpi eq, %10, %11 : vector<8x128xi32>
    %cst_6 = arith.constant 6.400000e+01 : f32
    %13 = vector.broadcast %cst_6 : f32 to vector<8x128xf32>
    %14 = arith.mulf %13, %5 : vector<8x128xf32>
    %cst_7 = arith.constant 2.240000e+01 : f32
    %cst_8 = arith.constant 0.000000e+00 : f32
    %15 = vector.broadcast %cst_7 : f32 to vector<8x128xf32>
    %16 = vector.broadcast %cst_8 : f32 to vector<8x128xf32>
    %17 = arith.select %12, %15, %16 : vector<8x128xi1>, vector<8x128xf32>
    %18 = arith.subf %14, %17 : vector<8x128xf32>
    %c16_i32 = arith.constant 16 : i32
    %19 = vector.broadcast %c16_i32 : i32 to vector<8x128xi32>
    %20 = arith.cmpi slt, %10, %19 : vector<8x128xi32>
    %cst_9 = arith.constant 0xFF800000 : f32
    %21 = vector.broadcast %cst_9 : f32 to vector<8x128xf32>
    %22 = arith.select %20, %18, %21 : vector<8x128xi1>, vector<8x128xf32>
    %c0_10 = arith.constant 0 : index
    %c0_11 = arith.constant 0 : index
    %23 = vector.load %arg7[%c0_10, %c0_11] : memref<8x1xf32, #tpu.memory_space<vmem>>, vector<8x1xf32>
    %cst_12 = arith.constant dense<0xFF800000> : vector<8xf32>
    %24 = vector.multi_reduction <maximumf>, %22, %cst_12 [1] : vector<8x128xf32> to vector<8xf32>
    %25 = vector.shape_cast %24 : vector<8xf32> to vector<8x1xf32>
    %26 = arith.maximumf %23, %25 : vector<8x1xf32>
    %27 = arith.subf %23, %26 : vector<8x1xf32>
    %28 = math.exp %27 : vector<8x1xf32>
    %c0_13 = arith.constant 0 : index
    %c0_14 = arith.constant 0 : index
    %29 = vector.load %arg8[%c0_13, %c0_14] : memref<8x1xf32, #tpu.memory_space<vmem>>, vector<8x1xf32>
    %30 = arith.mulf %28, %29 : vector<8x1xf32>
    %31 = vector.broadcast %26 : vector<8x1xf32> to vector<8x128xf32>
    %32 = arith.subf %22, %31 : vector<8x128xf32>
    %33 = math.exp %32 : vector<8x128xf32>
    %cst_15 = arith.constant dense<0.000000e+00> : vector<8xf32>
    %34 = vector.multi_reduction <add>, %33, %cst_15 [1] : vector<8x128xf32> to vector<8xf32>
    %35 = vector.shape_cast %34 : vector<8xf32> to vector<8x1xf32>
    %36 = arith.addf %30, %35 : vector<8x1xf32>
    %c0_16 = arith.constant 0 : index
    %c0_17 = arith.constant 0 : index
    %37 = vector.load %arg8[%c0_16, %c0_17] : memref<8x1xf32, #tpu.memory_space<vmem>>, vector<8x1xf32>
    tpu.vector_store %arg8[%c0_16, %c0_17], %36 {strides = array<i32>} : memref<8x1xf32, #tpu.memory_space<vmem>>, vector<8x1xf32>,
    %c0_18 = arith.constant 0 : index
    %c0_19 = arith.constant 0 : index
    %38 = vector.load %arg7[%c0_18, %c0_19] : memref<8x1xf32, #tpu.memory_space<vmem>>, vector<8x1xf32>
    tpu.vector_store %arg7[%c0_18, %c0_19], %26 {strides = array<i32>} : memref<8x1xf32, #tpu.memory_space<vmem>>, vector<8x1xf32>,
    %c0_20 = arith.constant 0 : index
    %c0_21 = arith.constant 0 : index
    %39 = vector.load %arg9[%c0_20, %c0_21] : memref<8x1xf32, #tpu.memory_space<vmem>>, vector<8x1xf32>
    %cst_22 = arith.constant 0.000000e+00 : f32
    %40 = vector.broadcast %cst_22 : f32 to vector<8x128xf32>
    %41 = arith.select %12, %22, %40 : vector<8x128xi1>, vector<8x128xf32>
    %cst_23 = arith.constant dense<0.000000e+00> : vector<8xf32>
    %42 = vector.multi_reduction <add>, %41, %cst_23 [1] : vector<8x128xf32> to vector<8xf32>
    %43 = vector.shape_cast %42 : vector<8xf32> to vector<8x1xf32>
    %44 = arith.addf %39, %43 : vector<8x1xf32>
    %c0_24 = arith.constant 0 : index
    %c0_25 = arith.constant 0 : index
    %45 = vector.load %arg9[%c0_24, %c0_25] : memref<8x1xf32, #tpu.memory_space<vmem>>, vector<8x1xf32>
    tpu.vector_store %arg9[%c0_24, %c0_25], %44 {strides = array<i32>} : memref<8x1xf32, #tpu.memory_space<vmem>>, vector<8x1xf32>,
    %c0_i32_26 = arith.constant 0 : i32
    %46 = arith.cmpi eq, %arg1, %c0_i32_26 : i32
    %47 = arith.extui %46 : i1 to i32
    %c0_i32_27 = arith.constant 0 : i32
    %48 = arith.cmpi ne, %47, %c0_i32_27 : i32
    scf.if %48 {
      %c0_28 = arith.constant 0 : index
      %c0_29 = arith.constant 0 : index
      %49 = vector.load %arg7[%c0_28, %c0_29] : memref<8x1xf32, #tpu.memory_space<vmem>>, vector<8x1xf32>
      %c0_30 = arith.constant 0 : index
      %c0_31 = arith.constant 0 : index
      %50 = vector.load %arg8[%c0_30, %c0_31] : memref<8x1xf32, #tpu.memory_space<vmem>>, vector<8x1xf32>
      %51 = math.log %50 : vector<8x1xf32>
      %52 = arith.addf %49, %51 : vector<8x1xf32>
      %c0_32 = arith.constant 0 : index
      %c0_33 = arith.constant 0 : index
      %53 = vector.load %arg9[%c0_32, %c0_33] : memref<8x1xf32, #tpu.memory_space<vmem>>, vector<8x1xf32>
      %54 = arith.subf %52, %53 : vector<8x1xf32>
      %c0_34 = arith.constant 0 : index
      %c0_35 = arith.constant 0 : index
      %55 = vector.load %arg5[%c0_34, %c0_35] : memref<8x1xf32, #tpu.memory_space<vmem>>, vector<8x1xf32>
      tpu.vector_store %arg5[%c0_34, %c0_35], %54 {strides = array<i32>} : memref<8x1xf32, #tpu.memory_space<vmem>>, vector<8x1xf32>,
    } else {
    }
    return
  }
  func.func @transform_0(%arg0: i32, %arg1: i32) -> (i32, i32) {
    %c0_i32 = arith.constant 0 : i32
    %c0_i32_0 = arith.constant 0 : i32
    return %arg0, %c0_i32 : i32, i32
  }
  func.func @transform_1(%arg0: i32, %arg1: i32) -> (i32, i32) {
    %c0_i32 = arith.constant 0 : i32
    %c0_i32_0 = arith.constant 0 : i32
    return %c0_i32, %arg1 : i32, i32
  }
  func.func @transform_2(%arg0: i32, %arg1: i32) -> (i32, i32) {
    %c0_i32 = arith.constant 0 : i32
    %c0_i32_0 = arith.constant 0 : i32
    return %arg0, %c0_i32 : i32, i32
  }
  func.func @transform_3(%arg0: i32, %arg1: i32) -> (i32, i32) {
    %c0_i32 = arith.constant 0 : i32
    %c0_i32_0 = arith.constant 0 : i32
    return %arg0, %c0_i32 : i32, i32
  }
}

</mosaic_0001>

<bundles_post_ra>
// kernel: tpu_custom_call.1
= control target key start
LH: loop header
LB: loop body
LE: loop exit
PB: predicated region body
PF: predicated region fallthrough
CT: control target
= control target key end

     0   :  { %8 = vsyncpa [#allocation7], 0  ;;  %s189_s15 = smov [#allocation6]   ;;  %s190_s17 = smov 128   ;;  %s239_s0 = inlined_call_operand.vmem [shape: f32[8,32], index: 0, kind: input, shape index: {}]   ;;  %s240_s1 = inlined_call_operand.hbm [shape: f32[32,128], index: 1, kind: input, shape index: {}]   ;;  %s241_s2 = inlined_call_operand.vmem [shape: s32[8,1], index: 2, kind: input, shape index: {}]   ;;  %s242_s3 = inlined_call_operand.vmem [shape: f32[8,1], index: 3, kind: output, shape index: {}]  }
   0x1   :  { %s15_s14 = sshll.u32 %s240_s1, 4  ;;  %s17_s16 = sshll.u32 %s189_s15, 4  ;;  %s16_s14 = int_to_ptr.hbm [resolvable:$true] %s15_s14  ;;  %s18_s16 = int_to_ptr.vmem [resolvable:$true] %s17_s16 }
   0x2   :  { %s191_s18 = smov 8  }
   0x3   :  { %23 = dma.hbm_to_vmem [thread:$0]  %s16_s14, 512, %s18_s16, [#allocation7], %s190_s17, %s190_s17, %s191_s18  }
   0x4   :  { %187 = dma.done.wait [#allocation7], 512  }
   0x5   :  { %188 = vsyncadd [#allocation7], 4294966784  ;;  %v34_v0 = vld [vmem:[%s239_s0] sm:$0xff]  ;;  %vm36_vm0 = vcmask 261120   ;;  %v61_v3 = vld [vmem:[#allocation6 + $0x18] sm:$0xff]  ;;  %v192_v9 = vmov 0   ;;  %v88_v22 = vlaneseq }
   0x6   :  { %v35_v1 = vmul.f32 %v34_v0, %v34_v0  ;;  %v60_v4 = vld [vmem:[#allocation6 + $0x10] sm:$0xff]  ;;  %78 = vmatpush.msra.mxu0 %v61_v3  ;;  %v59_v5 = vld [vmem:[#allocation6 + $0x8] sm:$0xff]  ;;  %v58_v6 = vld [vmem:[#allocation6] sm:$0xff]  ;;  %153 = vset.pattern.permute.xlu0 %v192_v9  ;;  %vm53_vm4 = vcmask 7168   ;;  %v193_v20 = vmov 0.0   ;;  %v194_v21 = vmov -inf  }
   0x7   :  { %v86_v7 = vld [vmem:[%s241_s2] sm:$0xff]  ;;  %154 = vset.pattern.permute.xlu1 %v192_v9  ;;  %55 = vst.msk [vmem:[#allocation4] sm:$0xff] %vm53_vm4, %v193_v20  ;;  %v89_v23 = vand.u32 127, %v88_v22 }
   0x8   :  { %v37_v2 = vsel %vm36_vm0, %v35_v1, 0.0  ;;  %79 = vmatpush.msra.mxu0 %v60_v4  ;;  %56 = vst.msk [vmem:[#allocation5] sm:$0xff] %vm53_vm4, %v193_v20 }
   0x9   :  { %38 = vadd.xlane.f32.xlu0 %v37_v2  ;;  %54 = vst.msk [vmem:[#allocation3] sm:$0xff] %vm53_vm4, %v194_v21  ;;  %vm99_vm6 = vcmp.lt.s32.totalorder %v89_v23, 16 }
   0xa   :  { %80 = vmatpush.msra.mxu0 %v59_v5 }
   0xc   :  { %81 = vmatpush.msra.mxu0 %v58_v6 }
   0xe   :  { %v108_v41 = vld [vmem:[#allocation4] sm:$0xff] }
   0xf   :  { %v124_v45 = vld [vmem:[#allocation5] sm:$0xff] }
  0x10   :  { %v101_v30 = vld [vmem:[#allocation3] sm:$0xff] }
  0x1d   :  { %93 = vperm.xlu0 %153, %v86_v7  }
  0x7c   :  { %v39_v8 = vpop.xlane.xlu0 %38 }
  0x7d   :  { %v40_v10 = vmax.f32 %v39_v8, 1e-24 }
  0x7f   :  { %155 = vrsqrt.f32 %v40_v10  ;;  %vm47_vm2 = vweird.f32 %v40_v10 }
  0x85   :  { %v156_v11 = vpop.eup %155 }
  0x86   :  { %v42_v12 = vmul.f32 %v156_v11, %v40_v10  ;;  %vm48_vm1 = vweird.f32 %v156_v11 }
  0x87   :  { %vm49_vm3 = vmor %vm47_vm2, %vm48_vm1 }
  0x88   :  { %v43_v13 = vmul.f32 %v156_v11, %v42_v12 }
  0x8a   :  { %v44_v14 = vmul.f32 0.5, %v43_v13 }
  0x8c   :  { %v45_v15 = vsub.f32 1.5, %v44_v14 }
  0x8e   :  { %v46_v16 = vmul.f32 %v156_v11, %v45_v15 }
  0x8f   :  { %v94_v24 = vpop.permute.xlu0 %93 }
  0x90   :  { %v50_v17 = vsel %vm49_vm3, %v156_v11, %v46_v16  ;;  %vm95_vm5 = vcmp.eq.s32.totalorder %v89_v23, %v94_v24 }
  0x91   :  { %v51_v18 = vmul.f32 %v50_v17, %v34_v0  ;;  %v97_v26 = vsel %vm95_vm5, 22.4, %v193_v20 }
  0x93   :  { %52 = vst.msk [vmem:[#allocation2] sm:$0xff] %vm36_vm0, %v51_v18 }
  0x9a   :  { %v57_v19 = vld [vmem:[#allocation2] sm:$0xff] }
  0x9b   :  { %146 = vmatmul.msk.f32.vlgmr.msra.gmra.mxu0 %vm36_vm0, %v57_v19 }
 0x118   :  { %v83_v25 = vpop.f32.mrf.mxu0 }
 0x119   :  { %v96_v27 = vmul.f32 64.0, %v83_v25 }
 0x11b   :  { %v98_v28 = vsub.f32 %v96_v27, %v97_v26 }
 0x11d   :  { %v100_v29 = vsel %vm99_vm6, %v98_v28, -inf }
 0x11e   :  { %102 = vmax.xlane.f32.xlu1 %v100_v29  ;;  %v125_v38 = vsel %vm95_vm5, %v100_v29, 0.0 }
 0x191   :  { %v103_v31 = vpop.xlane.xlu1 %102 }
 0x192   :  { %v104_v32 = vmax.f32 %v101_v30, %v103_v31 }
 0x194   :  { %v105_v33 = vsub.f32 %v101_v30, %v104_v32  ;;  %123 = vst.msk [vmem:[#allocation3] sm:$0xff] %vm53_vm4, %v104_v32  ;;  %112 = vperm.xlu1 %154, %v104_v32  }
 0x196   :  { %v106_v39 = vmul.f32 1.442695, %v105_v33 }
 0x19b   :  { %v133_v51 = vld [vmem:[#allocation3] sm:$0xff] }
 0x206   :  { %v113_v34 = vpop.permute.xlu1 %112 }
 0x207   :  { %v115_v35 = vsub.f32 %v100_v29, %v113_v34 }
 0x209   :  { %v116_v36 = vmul.f32 1.442695, %v115_v35 }
 0x20b   :  { %157 = vpow2.f32 %v116_v36 }
 0x20c   :  { %159 = vpow2.f32 %v106_v39 }
 0x211   :  { %v158_v37 = vpop.eup %157 }
 0x212   :  { %118 = vadd.xlane.f32.xlu2 %v158_v37  ;;  %v160_v40 = vpop.eup %159 }
 0x213   :  { %v109_v42 = vmul.f32 %v160_v40, %v108_v41 }
 0x21a   :  { %126 = vadd.xlane.f32.xlu2 %v125_v38 }
 0x285   :  { %v119_v43 = vpop.xlane.xlu2 %118 }
 0x286   :  { %v120_v44 = vadd.f32 %v119_v43, %v109_v42 }
 0x288   :  { %122 = vst.msk [vmem:[#allocation4] sm:$0xff] %vm53_vm4, %v120_v44 }
 0x28d   :  { %v127_v46 = vpop.xlane.xlu2 %126 }
 0x28e   :  { %v128_v47 = vadd.f32 %v127_v46, %v124_v45 }
 0x28f   :  { %v134_v48 = vld [vmem:[#allocation4] sm:$0xff] }
 0x290   :  { %161 = vlog2.f32 %v134_v48  ;;  %129 = vst.msk [vmem:[#allocation5] sm:$0xff] %vm53_vm4, %v128_v47 }
 0x296   :  { %v162_v49 = vpop.eup %161 }
 0x297   :  { %v136_v50 = vmul.f32 0.6931472, %v162_v49  ;;  %v138_v53 = vld [vmem:[#allocation5] sm:$0xff] }
 0x299   :  { %v137_v52 = vadd.f32 %v136_v50, %v133_v51 }
 0x29b   :  { %v139_v54 = vsub.f32 %v137_v52, %v138_v53 }
 0x29d   :  { %140 = vst.msk [vmem:[%s242_s3] sm:$0xff] %vm53_vm4, %v139_v54 }
 0x29e   :  { %145 = vsyncpa [#allocation7], 1 }

</bundles_post_ra>
